<compile_context>
chip_gen: v5e
topology: v5e:2x2
jax: 0.10.0
libtpu: 0.0.40
codegen_flags: <defaults>
</compile_context>

<pallas_src>
import jax
import jax.numpy as jnp
from jax.experimental import pallas as pl
from jax.experimental.pallas import tpu as pltpu


def _round_up(x, m):
    return (x + m - 1) // m * m


def _make_textcnn_kernel(tile_b, s_pos, k_pad, c_pad, n_out):
    """One grid step = one batch tile of tile_b samples."""

    def kernel(slab_ref, w_ref, mask_ref, bias_ref, dw_ref, db_ref, o_ref):
        # (tile_b, s_pos, k_pad) -> (tile_b*s_pos, k_pad): pure leading-dim
        # merge (s_pos is sublane-packing aligned), no relayout.
        slab = slab_ref[...].reshape(tile_b * s_pos, k_pad)

        # ALL conv widths in one MXU matmul: shorter kernels' unused taps and
        # the k_pad padding are zero rows in w_ref. f32 accumulation.
        acc = jnp.dot(slab, w_ref[...],
                      preferred_element_type=jnp.float32)   # (tile_b*s_pos, c_pad)
        acc = acc.reshape(tile_b, s_pos, c_pad)

        # mask positions past each conv's valid length (kept in f32 so -1e30
        # stays finite), then global max pool over positions.
        acc = acc + mask_ref[...]                            # (s_pos, c_pad) bcast
        pooled = jnp.max(acc, axis=1)                        # (tile_b, c_pad)

        # bias after pool (exact: bias constant per channel) + ReLU
        enc = jnp.maximum(pooled + bias_ref[...], 0.0)       # (tile_b, c_pad) f32

        # fused decoder, lane-padded to n_out = 128 (wrapper slices [:, :2])
        o_ref[...] = jnp.dot(enc, dw_ref[...],
                             preferred_element_type=jnp.float32) + db_ref[...]

    return kernel


def pack_textcnn_params(params, kernel_sizes, num_channels, seq_len, *,
                        compute_dtype=jnp.bfloat16):
    """One-time packing of conv/decoder params into padded, MXU-ready slabs.

    Call once at model init and pass the result to textcnn_forward — the
    transposes / pads / concats here are NOT in the steady-state path.
    """
    compute_dtype = jnp.dtype(compute_dtype)
    D = params["embedding"].shape[1] + params["constant_embedding"].shape[1]
    kmax = max(kernel_sizes)
    sum_c = sum(num_channels)
    n_classes = params["dec_w"].shape[0]
    S = seq_len
    assert S >= kmax, "sequence must be at least as long as the widest kernel"

    sub = 16 if compute_dtype == jnp.dtype(jnp.bfloat16) else 8
    s_pos = _round_up(S, sub)                 # conv positions computed / sample
    s_in = s_pos + kmax - 1                   # padded input rows a window touches
    k_pad = _round_up(kmax * D, 128)          # lane-dense contraction dim
    c_pad = _round_up(max(sum_c, 128), 128)   # lane-dense channel dim
    n_out = 128                               # lane-dense decoder output

    w_cols, b_cols, vmax_cols = [], [], []
    for i, (c, k) in enumerate(zip(num_channels, kernel_sizes)):
        w = params["conv_w"][i]                              # torch (C, D, k)
        w = jnp.transpose(w, (2, 1, 0)).reshape(k * D, c)    # tap-major (k*D, C)
        w = jnp.pad(w, ((0, (kmax - k) * D), (0, 0)))        # zero unused taps
        w_cols.append(w)
        b_cols.append(params["conv_b"][i])
        vmax_cols.append(jnp.full((c,), S - k, jnp.int32))   # last valid position
    w_slab = jnp.concatenate(w_cols, axis=1)                 # (kmax*D, sum_c)
    w_slab = jnp.pad(w_slab, ((0, k_pad - kmax * D), (0, c_pad - sum_c)))
    w_slab = w_slab.astype(compute_dtype)

    bias = jnp.pad(jnp.concatenate(b_cols), (0, c_pad - sum_c))
    bias = bias.reshape(1, c_pad).astype(jnp.float32)

    vmax = jnp.pad(jnp.concatenate(vmax_cols), (0, c_pad - sum_c))
    pos = jnp.arange(s_pos, dtype=jnp.int32)[:, None]
    # additive mask: 0 where position valid, -1e30 otherwise (stays f32!)
    neg_mask = jnp.where(pos <= vmax[None, :], 0.0, -1e30).astype(jnp.float32)

    dec_w = jnp.pad(params["dec_w"].T,
                    ((0, c_pad - sum_c), (0, n_out - n_classes))).astype(jnp.float32)
    dec_b = jnp.pad(params["dec_b"], (0, n_out - n_classes))
    dec_b = dec_b.reshape(1, n_out).astype(jnp.float32)

    geom = dict(S=S, D=D, kmax=kmax, s_pos=s_pos, s_in=s_in, k_pad=k_pad,
                c_pad=c_pad, n_out=n_out, n_classes=n_classes)
    return dict(w_slab=w_slab, bias=bias, neg_mask=neg_mask,
                dec_w=dec_w, dec_b=dec_b, geom=geom,
                compute_dtype=compute_dtype)


def textcnn_forward(inputs, params, packed, *, tile_b=None):
    """inputs: int32 token ids of shape (B, S); packed: pack_textcnn_params(...)."""
    g = packed["geom"]
    compute_dtype = packed["compute_dtype"]
    D, kmax = g["D"], g["kmax"]
    s_pos, s_in = g["s_pos"], g["s_in"]
    k_pad, c_pad, n_out = g["k_pad"], g["c_pad"], g["n_out"]

    B, S = inputs.shape
    assert S == g["S"], "packed params were built for a different seq length"

    # ---- batch tile selection --------------------------------------------
    if tile_b is None:
        min_tile = 16 if compute_dtype == jnp.dtype(jnp.bfloat16) else 8
        # fill the MXU: >= 256 sublane rows per step. One step is fine for
        # small B (v5e/v6e are single-TC; tiny extra steps only add ~0.35us
        # fixed overhead each). Large B gives many "parallel" steps, which is
        # exactly what v7x's two TensorCores want.
        tile_b = _round_up(max(min_tile, pl.cdiv(256, s_pos)), min_tile)
        tile_b = min(tile_b, _round_up(B, min_tile))
        # cap so in-kernel live data stays well under the scoped VMEM limit
        # (v7x: 64 MiB physical / 32 MiB default scoped).
        itemsize = compute_dtype.itemsize
        fixed = 2 * (k_pad * c_pad * itemsize + (s_pos + 2) * c_pad * 4
                     + (c_pad + 1) * n_out * 4)
        per_sample = 2 * s_pos * k_pad * itemsize + s_pos * c_pad * 4 + 2 * n_out * 4
        budget = 24 * 1024 * 1024
        cap = max(min_tile, (budget - fixed) // per_sample // min_tile * min_tile)
        tile_b = max(min_tile, min(tile_b, cap))
    b_pad = _round_up(B, tile_b)

    # ---- embedding gather + lane-dense im2col (plain-JAX glue) ------------
    x = jnp.concatenate([params["embedding"][inputs],
                         params["constant_embedding"][inputs]], axis=-1)  # (B,S,D) f32
    x = jnp.pad(x, ((0, b_pad - B), (0, s_in - S), (0, 0)))
    # slab[b, p, j*D + dd] = x[b, p+j, dd]; lanes >= kmax*D are zero and match
    # the zero rows of the packed weight slab.
    slab = jnp.concatenate([x[:, j:j + s_pos, :] for j in range(kmax)], axis=-1)
    slab = jnp.pad(slab, ((0, 0), (0, 0), (0, k_pad - kmax * D)))
    slab = slab.astype(compute_dtype)                        # (b_pad, s_pos, k_pad)

    # TODO(synk): nn.Dropout(0.5) is identity in eval mode; training-mode
    # random masking is not implemented here.

    kern = _make_textcnn_kernel(tile_b, s_pos, k_pad, c_pad, n_out)

    out = pl.pallas_call(
        kern,
        out_shape=jax.ShapeDtypeStruct((b_pad, n_out), jnp.float32),
        grid=(b_pad // tile_b,),
        in_specs=[
            pl.BlockSpec((tile_b, s_pos, k_pad), lambda b: (b, 0, 0)),  # im2col slab
            pl.BlockSpec((k_pad, c_pad), lambda b: (0, 0)),             # conv weights
            pl.BlockSpec((s_pos, c_pad), lambda b: (0, 0)),             # validity mask
            pl.BlockSpec((1, c_pad), lambda b: (0, 0)),                 # conv bias
            pl.BlockSpec((c_pad, n_out), lambda b: (0, 0)),             # decoder weight
            pl.BlockSpec((1, n_out), lambda b: (0, 0)),                 # decoder bias
        ],
        out_specs=pl.BlockSpec((tile_b, n_out), lambda b: (b, 0)),
        compiler_params=pltpu.CompilerParams(
            dimension_semantics=("parallel",)),
    )(slab, packed["w_slab"], packed["neg_mask"], packed["bias"],
      packed["dec_w"], packed["dec_b"])

    return out[:B, :g["n_classes"]]


def textcnn_reference(inputs, params, kernel_sizes, num_channels):
    """Plain-JAX replica of the PyTorch forward pass (NCW conv)."""
    x = jnp.concatenate([params["embedding"][inputs],
                         params["constant_embedding"][inputs]], axis=-1)
    x = jnp.transpose(x, (0, 2, 1))  # (B, 2E, S)
    encs = []
    for i, ks in enumerate(kernel_sizes):
        w = params["conv_w"][i]
        b = params["conv_b"][i]
        y = jax.lax.conv_general_dilated(
            x, w, window_strides=(1,), padding="VALID",
            dimension_numbers=("NCH", "OIH", "NCH"))
        y = y + b[None, :, None]
        y = jnp.max(y, axis=-1)          # AdaptiveMaxPool1d(1) + squeeze
        y = jnp.maximum(y, 0.0)          # ReLU
        encs.append(y)
    enc = jnp.concatenate(encs, axis=1)
    return enc @ params["dec_w"].T + params["dec_b"]


if __name__ == "__main__":
    vocab_size, embed_size = 50, 16
    kernel_sizes = (3, 4, 5)
    num_channels = (8, 8, 8)
    B, S = 2, 12

    key = jax.random.PRNGKey(0)
    keys = jax.random.split(key, 16)
    params = {
        "embedding": 0.1 * jax.random.normal(keys[0], (vocab_size, embed_size), jnp.float32),
        "constant_embedding": 0.1 * jax.random.normal(keys[1], (vocab_size, embed_size), jnp.float32),
        "conv_w": [0.1 * jax.random.normal(keys[2 + i], (c, 2 * embed_size, ks), jnp.float32)
                   for i, (c, ks) in enumerate(zip(num_channels, kernel_sizes))],
        "conv_b": [0.1 * jax.random.normal(keys[5 + i], (c,), jnp.float32)
                   for i, c in enumerate(num_channels)],
        "dec_w": 0.1 * jax.random.normal(keys[8], (2, sum(num_channels)), jnp.float32),
        "dec_b": 0.1 * jax.random.normal(keys[9], (2,), jnp.float32),
    }
    inputs = jax.random.randint(keys[10], (B, S), 0, vocab_size, dtype=jnp.int32)

    ref = textcnn_reference(inputs, params, kernel_sizes, num_channels)

    # f32 path: tight correctness check
    packed_f32 = pack_textcnn_params(params, kernel_sizes, num_channels, S,
                                     compute_dtype=jnp.float32)
    out_f32 = jax.block_until_ready(textcnn_forward(inputs, params, packed_f32))
    assert out_f32.shape == (B, 2), out_f32.shape
    assert jnp.allclose(out_f32, ref, atol=1e-4, rtol=1e-4), (out_f32, ref)

    # bf16 path (default; MXU-native activations/weights), looser tolerance
    packed_bf16 = pack_textcnn_params(params, kernel_sizes, num_channels, S)
    out_bf16 = jax.block_until_ready(textcnn_forward(inputs, params, packed_bf16))
    assert out_bf16.shape == (B, 2), out_bf16.shape
    assert jnp.allclose(out_bf16, ref, atol=2e-2, rtol=2e-2), (out_bf16, ref)

    print("KERNEL_OK")
</pallas_src>

<mosaic_0001>
module attributes {stable_mosaic.version = 11 : i64} {
  func.func @kernel(%arg0: i32, %arg1: memref<8x16x256xf32, #tpu.memory_space<vmem>>, %arg2: memref<256x128xf32, #tpu.memory_space<vmem>>, %arg3: memref<16x128xf32, #tpu.memory_space<vmem>>, %arg4: memref<1x128xf32, #tpu.memory_space<vmem>>, %arg5: memref<128x128xf32, #tpu.memory_space<vmem>>, %arg6: memref<1x128xf32, #tpu.memory_space<vmem>>, %arg7: memref<8x128xf32, #tpu.memory_space<vmem>>) attributes {dimension_semantics = [#tpu.dimension_semantics<parallel>], iteration_bounds = array<i64: 1>, scalar_prefetch = 0 : i64, scratch_operands = 0 : i64, tpu.core_type = #tpu.core_type<tc>, window_params = [{transform_indices = @transform_0, window_bounds = array<i64: 8, 16, 256>}, {pipeline_mode = #tpu.pipeline_mode<synchronous>, transform_indices = @transform_1, window_bounds = array<i64: 256, 128>}, {pipeline_mode = #tpu.pipeline_mode<synchronous>, transform_indices = @transform_2, window_bounds = array<i64: 16, 128>}, {pipeline_mode = #tpu.pipeline_mode<synchronous>, transform_indices = @transform_3, window_bounds = array<i64: 1, 128>}, {pipeline_mode = #tpu.pipeline_mode<synchronous>, transform_indices = @transform_4, window_bounds = array<i64: 128, 128>}, {pipeline_mode = #tpu.pipeline_mode<synchronous>, transform_indices = @transform_5, window_bounds = array<i64: 1, 128>}, {transform_indices = @transform_6, window_bounds = array<i64: 8, 128>}]} {
    %c0 = arith.constant 0 : index
    %c0_0 = arith.constant 0 : index
    %c0_1 = arith.constant 0 : index
    %0 = vector.load %arg1[%c0, %c0_0, %c0_1] : memref<8x16x256xf32, #tpu.memory_space<vmem>>, vector<8x16x256xf32>
    %1 = vector.shape_cast %0 : vector<8x16x256xf32> to vector<128x256xf32>
    %c0_2 = arith.constant 0 : index
    %c0_3 = arith.constant 0 : index
    %2 = vector.load %arg2[%c0_2, %c0_3] : memref<256x128xf32, #tpu.memory_space<vmem>>, vector<256x128xf32>
    %cst = arith.constant dense<0.000000e+00> : vector<128x128xf32>
    %3 = tpu.matmul %1, %2, %cst {dimension_numbers = #tpu.dot_dimension_numbers<[1], [0], [0], [1], [0, 0, 1, 1], [], []>} : vector<128x256xf32>, vector<256x128xf32>, vector<128x128xf32> -> vector<128x128xf32>
    %4 = vector.shape_cast %3 : vector<128x128xf32> to vector<8x16x128xf32>
    %c0_4 = arith.constant 0 : index
    %c0_5 = arith.constant 0 : index
    %5 = vector.load %arg3[%c0_4, %c0_5] : memref<16x128xf32, #tpu.memory_space<vmem>>, vector<16x128xf32>
    %6 = vector.shape_cast %5 : vector<16x128xf32> to vector<1x16x128xf32>
    %7 = vector.broadcast %6 : vector<1x16x128xf32> to vector<8x16x128xf32>
    %8 = arith.addf %4, %7 : vector<8x16x128xf32>
    %cst_6 = arith.constant dense<0xFF800000> : vector<8x128xf32>
    %9 = vector.multi_reduction <maximumf>, %8, %cst_6 [1] : vector<8x16x128xf32> to vector<8x128xf32>
    %c0_7 = arith.constant 0 : index
    %c0_8 = arith.constant 0 : index
    %10 = vector.load %arg4[%c0_7, %c0_8] : memref<1x128xf32, #tpu.memory_space<vmem>>, vector<1x128xf32>
    %11 = vector.broadcast %10 : vector<1x128xf32> to vector<8x128xf32>
    %12 = arith.addf %9, %11 : vector<8x128xf32>
    %cst_9 = arith.constant 0.000000e+00 : f32
    %13 = vector.broadcast %cst_9 : f32 to vector<8x128xf32>
    %14 = arith.maximumf %12, %13 : vector<8x128xf32>
    %c0_10 = arith.constant 0 : index
    %c0_11 = arith.constant 0 : index
    %15 = vector.load %arg5[%c0_10, %c0_11] : memref<128x128xf32, #tpu.memory_space<vmem>>, vector<128x128xf32>
    %cst_12 = arith.constant dense<0.000000e+00> : vector<8x128xf32>
    %16 = tpu.matmul %14, %15, %cst_12 {dimension_numbers = #tpu.dot_dimension_numbers<[1], [0], [0], [1], [0, 0, 1, 1], [], []>} : vector<8x128xf32>, vector<128x128xf32>, vector<8x128xf32> -> vector<8x128xf32>
    %c0_13 = arith.constant 0 : index
    %c0_14 = arith.constant 0 : index
    %17 = vector.load %arg6[%c0_13, %c0_14] : memref<1x128xf32, #tpu.memory_space<vmem>>, vector<1x128xf32>
    %18 = vector.broadcast %17 : vector<1x128xf32> to vector<8x128xf32>
    %19 = arith.addf %16, %18 : vector<8x128xf32>
    %c0_15 = arith.constant 0 : index
    %c0_16 = arith.constant 0 : index
    %20 = vector.load %arg7[%c0_15, %c0_16] : memref<8x128xf32, #tpu.memory_space<vmem>>, vector<8x128xf32>
    tpu.vector_store %arg7[%c0_15, %c0_16], %19 {strides = array<i32>} : memref<8x128xf32, #tpu.memory_space<vmem>>, vector<8x128xf32>,
    return
  }
  func.func @transform_0(%arg0: i32) -> (i32, i32, i32) {
    %c0_i32 = arith.constant 0 : i32
    %c0_i32_0 = arith.constant 0 : i32
    %c0_i32_1 = arith.constant 0 : i32
    return %arg0, %c0_i32, %c0_i32_0 : i32, i32, i32
  }
  func.func @transform_1(%arg0: i32) -> (i32, i32) {
    %c0_i32 = arith.constant 0 : i32
    %c0_i32_0 = arith.constant 0 : i32
    %c0_i32_1 = arith.constant 0 : i32
    return %c0_i32, %c0_i32_0 : i32, i32
  }
  func.func @transform_2(%arg0: i32) -> (i32, i32) {
    %c0_i32 = arith.constant 0 : i32
    %c0_i32_0 = arith.constant 0 : i32
    %c0_i32_1 = arith.constant 0 : i32
    return %c0_i32, %c0_i32_0 : i32, i32
  }
  func.func @transform_3(%arg0: i32) -> (i32, i32) {
    %c0_i32 = arith.constant 0 : i32
    %c0_i32_0 = arith.constant 0 : i32
    %c0_i32_1 = arith.constant 0 : i32
    return %c0_i32, %c0_i32_0 : i32, i32
  }
  func.func @transform_4(%arg0: i32) -> (i32, i32) {
    %c0_i32 = arith.constant 0 : i32
    %c0_i32_0 = arith.constant 0 : i32
    %c0_i32_1 = arith.constant 0 : i32
    return %c0_i32, %c0_i32_0 : i32, i32
  }
  func.func @transform_5(%arg0: i32) -> (i32, i32) {
    %c0_i32 = arith.constant 0 : i32
    %c0_i32_0 = arith.constant 0 : i32
    %c0_i32_1 = arith.constant 0 : i32
    return %c0_i32, %c0_i32_0 : i32, i32
  }
  func.func @transform_6(%arg0: i32) -> (i32, i32) {
    %c0_i32 = arith.constant 0 : i32
    %c0_i32_0 = arith.constant 0 : i32
    return %arg0, %c0_i32 : i32, i32
  }
}

</mosaic_0001>

<bundles_post_ra>
// kernel: tpu_custom_call.1
= control target key start
LH: loop header
LB: loop body
LE: loop exit
PB: predicated region body
PF: predicated region fallthrough
CT: control target
= control target key end

     0   :  { %11 = vsyncpa [#allocation3], 0  ;;  %s727_s0 = inlined_call_operand.hbm [shape: f32[8,16,256], index: 0, kind: input, shape index: {}]   ;;  %s728_s1 = inlined_call_operand.hbm [shape: f32[256,128], index: 1, kind: input, shape index: {}]   ;;  %s729_s2 = inlined_call_operand.hbm [shape: f32[16,128], index: 2, kind: input, shape index: {}]   ;;  %s730_s3 = inlined_call_operand.vmem [shape: f32[1,128], index: 3, kind: input, shape index: {}]   ;;  %s731_s4 = inlined_call_operand.hbm [shape: f32[128,128], index: 4, kind: input, shape index: {}]   ;;  %s732_s5 = inlined_call_operand.vmem [shape: f32[1,128], index: 5, kind: input, shape index: {}]   ;;  %s733_s6 = inlined_call_operand.hbm [shape: f32[8,128], index: 6, kind: output, shape index: {}]  }
   0x1   :  { %12 = vsyncpa [#allocation6], 0 }
   0x2   :  { %13 = vsyncpa [#allocation9], 0  ;;  %s32_s23 = sshll.u32 %s728_s1, 4  ;;  %s33_s23 = int_to_ptr.hbm [resolvable:$true] %s32_s23 }
   0x3   :  { %14 = vsyncpa [#allocation4], 0  ;;  %s636_s24 = smov [#allocation5]   ;;  %s19_s28 = sshll.u32 %s727_s0, 4  ;;  %s20_s28 = int_to_ptr.hbm [resolvable:$true] %s19_s28 }
   0x4   :  { %s34_s25 = sshll.u32 %s636_s24, 4  ;;  %s637_s29 = smov 128   ;;  %s35_s25 = int_to_ptr.vmem [resolvable:$true] %s34_s25 }
   0x5   :  { %s638_s30 = smov 8   ;;  %s639_s7 = smov [#allocation2]  }
   0x6   :  { %40 = dma.hbm_to_vmem [thread:$0]  %s33_s23, 4096, %s35_s25, [#allocation6], %s637_s29, %s637_s29, %s638_s30  }
   0x7   :  { %s21_s8 = sshll.u32 %s639_s7, 4  ;;  %s640_s9 = smov 256   ;;  %s22_s8 = int_to_ptr.vmem [resolvable:$true] %s21_s8 }
   0x8   :  { %s641_s10 = smov 16   ;;  %s45_s12 = sshll.u32 %s729_s2, 4  ;;  %s46_s12 = int_to_ptr.hbm [resolvable:$true] %s45_s12 }
   0x9   :  { %27 = dma.hbm_to_vmem [thread:$0]  %s20_s28, 4096, %s22_s8, [#allocation3], %s640_s9, %s640_s9, %s641_s10  }
   0xa   :  { %s642_s13 = smov [#allocation7]   ;;  %s60_s16 = sshll.u32 %s731_s4, 4  ;;  %s61_s16 = int_to_ptr.hbm [resolvable:$true] %s60_s16 }
   0xb   :  { %s47_s14 = sshll.u32 %s642_s13, 4  ;;  %s643_s17 = smov [#allocation8]   ;;  %s48_s14 = int_to_ptr.vmem [resolvable:$true] %s47_s14 }
   0xc   :  { %53 = dma.hbm_to_vmem [thread:$0]  %s46_s12, 256, %s48_s14, [#allocation6], %s637_s29, %s637_s29, %s638_s30  }
   0xd   :  { %s62_s18 = sshll.u32 %s643_s17, 4  ;;  %s63_s18 = int_to_ptr.vmem [resolvable:$true] %s62_s18 }
   0xe   :  { %68 = dma.hbm_to_vmem [thread:$0]  %s61_s16, 2048, %s63_s18, [#allocation9], %s637_s29, %s637_s29, %s638_s30  }
   0xf   :  { %628 = dma.done.wait [#allocation3], 4096  }
  0x10   :  { %629 = vsyncadd [#allocation3], 4294963200 }
  0x11   :  { %630 = dma.done.wait [#allocation6], 4352  }
  0x12   :  { %631 = vsyncadd [#allocation6], 4294962944 }
  0x13   :  { %632 = dma.done.wait [#allocation9], 2048  }
  0x14   :  { %633 = vsyncadd [#allocation9], 4294965248  ;;  %v134_v0 = vld [vmem:[#allocation5 + $0x78] sm:$0xff]  ;;  %v133_v2 = vld [vmem:[#allocation5 + $0x70] sm:$0xff]  ;;  %vm404_vm0 = vcmask 1041409   ;;  %vm407_vm1 = vcmask 1042434  }
  0x15   :  { %v150_v1 = vld [vmem:[#allocation5 + $0xf8] sm:$0xff]  ;;  %151 = vmatpush.msra.mxu0 %v134_v0  ;;  %465 = vmatpush.msra.mxu3 %v134_v0  ;;  %v149_v3 = vld [vmem:[#allocation5 + $0xf0] sm:$0xff]  ;;  %v132_v4 = vld [vmem:[#allocation5 + $0x68] sm:$0xff]  ;;  %vm410_vm2 = vcmask 1043459   ;;  %vm413_vm3 = vcmask 1044484   ;;  %vm416_vm4 = vcmask 1045509  }
  0x16   :  { %216 = vmatpush.msra.mxu1 %v150_v1  ;;  %481 = vmatpush.msra.mxu2 %v150_v1  ;;  %v148_v5 = vld [vmem:[#allocation5 + $0xe8] sm:$0xff]  ;;  %v131_v6 = vld [vmem:[#allocation5 + $0x60] sm:$0xff]  ;;  %v130_v8 = vld [vmem:[#allocation5 + $0x58] sm:$0xff]  ;;  %vm419_vm5 = vcmask 1046534   ;;  %vm422_vm6 = vcmask 1047559   ;;  %s644_s20 = smov [#allocation10]  }
  0x17   :  { %152 = vmatpush.msra.mxu0 %v133_v2  ;;  %466 = vmatpush.msra.mxu3 %v133_v2  ;;  %v147_v7 = vld [vmem:[#allocation5 + $0xe0] sm:$0xff]  ;;  %v146_v9 = vld [vmem:[#allocation5 + $0xd8] sm:$0xff]  ;;  %v129_v10 = vld [vmem:[#allocation5 + $0x50] sm:$0xff]  ;;  %s451_s21 = sshll.u32 %s644_s20, 4  ;;  %s453_s24 = sshll.u32 %s733_s6, 4  ;;  %s452_s21 = int_to_ptr.vmem [resolvable:$true] %s451_s21  ;;  %s454_s24 = int_to_ptr.hbm [resolvable:$true] %s453_s24 }
  0x18   :  { %217 = vmatpush.msra.mxu1 %v149_v3  ;;  %482 = vmatpush.msra.mxu2 %v149_v3  ;;  %v145_v11 = vld [vmem:[#allocation5 + $0xd0] sm:$0xff]  ;;  %v128_v12 = vld [vmem:[#allocation5 + $0x48] sm:$0xff]  ;;  %v127_v14 = vld [vmem:[#allocation5 + $0x40] sm:$0xff] }
  0x19   :  { %153 = vmatpush.msra.mxu0 %v132_v4  ;;  %467 = vmatpush.msra.mxu3 %v132_v4  ;;  %v144_v13 = vld [vmem:[#allocation5 + $0xc8] sm:$0xff]  ;;  %v143_v15 = vld [vmem:[#allocation5 + $0xc0] sm:$0xff]  ;;  %v126_v16 = vld [vmem:[#allocation5 + $0x38] sm:$0xff] }
  0x1a   :  { %218 = vmatpush.msra.mxu1 %v148_v5  ;;  %483 = vmatpush.msra.mxu2 %v148_v5  ;;  %v142_v17 = vld [vmem:[#allocation5 + $0xb8] sm:$0xff]  ;;  %v125_v18 = vld [vmem:[#allocation5 + $0x30] sm:$0xff]  ;;  %v124_v20 = vld [vmem:[#allocation5 + $0x28] sm:$0xff] }
  0x1b   :  { %154 = vmatpush.msra.mxu0 %v131_v6  ;;  %468 = vmatpush.msra.mxu3 %v131_v6  ;;  %v141_v19 = vld [vmem:[#allocation5 + $0xb0] sm:$0xff]  ;;  %v140_v21 = vld [vmem:[#allocation5 + $0xa8] sm:$0xff]  ;;  %v123_v22 = vld [vmem:[#allocation5 + $0x20] sm:$0xff] }
  0x1c   :  { %219 = vmatpush.msra.mxu1 %v147_v7  ;;  %484 = vmatpush.msra.mxu2 %v147_v7  ;;  %v139_v23 = vld [vmem:[#allocation5 + $0xa0] sm:$0xff]  ;;  %v122_v24 = vld [vmem:[#allocation5 + $0x18] sm:$0xff]  ;;  %v121_v26 = vld [vmem:[#allocation5 + $0x10] sm:$0xff] }
  0x1d   :  { %155 = vmatpush.msra.mxu0 %v130_v8  ;;  %469 = vmatpush.msra.mxu3 %v130_v8  ;;  %v138_v25 = vld [vmem:[#allocation5 + $0x98] sm:$0xff]  ;;  %v137_v27 = vld [vmem:[#allocation5 + $0x90] sm:$0xff]  ;;  %v120_v28 = vld [vmem:[#allocation5 + $0x8] sm:$0xff] }
  0x1e   :  { %220 = vmatpush.msra.mxu1 %v146_v9  ;;  %485 = vmatpush.msra.mxu2 %v146_v9  ;;  %v136_v29 = vld [vmem:[#allocation5 + $0x88] sm:$0xff]  ;;  %v119_v30 = vld [vmem:[#allocation5] sm:$0xff]  ;;  %v105_v33 = vld [vmem:[#allocation2 + $0x90] sm:$0xff] }
  0x1f   :  { %156 = vmatpush.msra.mxu0 %v129_v10  ;;  %470 = vmatpush.msra.mxu3 %v129_v10  ;;  %v135_v31 = vld [vmem:[#allocation5 + $0x80] sm:$0xff]  ;;  %v88_v34 = vld [vmem:[#allocation2 + $0x8] sm:$0xff]  ;;  %v106_v35 = vld [vmem:[#allocation2 + $0x98] sm:$0xff] }
  0x20   :  { %221 = vmatpush.msra.mxu1 %v145_v11  ;;  %486 = vmatpush.msra.mxu2 %v145_v11  ;;  %v87_v32 = vld [vmem:[#allocation2] sm:$0xff]  ;;  %v89_v36 = vld [vmem:[#allocation2 + $0x10] sm:$0xff]  ;;  %v90_v38 = vld [vmem:[#allocation2 + $0x18] sm:$0xff] }
  0x21   :  { %157 = vmatpush.msra.mxu0 %v128_v12  ;;  %471 = vmatpush.msra.mxu3 %v128_v12  ;;  %v107_v37 = vld [vmem:[#allocation2 + $0xa0] sm:$0xff]  ;;  %v108_v39 = vld [vmem:[#allocation2 + $0xa8] sm:$0xff]  ;;  %v109_v41 = vld [vmem:[#allocation2 + $0xb0] sm:$0xff] }
  0x22   :  { %222 = vmatpush.msra.mxu1 %v144_v13  ;;  %487 = vmatpush.msra.mxu2 %v144_v13  ;;  %v91_v40 = vld [vmem:[#allocation2 + $0x20] sm:$0xff]  ;;  %v92_v42 = vld [vmem:[#allocation2 + $0x28] sm:$0xff]  ;;  %v110_v43 = vld [vmem:[#allocation2 + $0xb8] sm:$0xff] }
  0x23   :  { %158 = vmatpush.msra.mxu0 %v127_v14  ;;  %472 = vmatpush.msra.mxu3 %v127_v14  ;;  %v93_v44 = vld [vmem:[#allocation2 + $0x30] sm:$0xff]  ;;  %v111_v45 = vld [vmem:[#allocation2 + $0xc0] sm:$0xff]  ;;  %v94_v46 = vld [vmem:[#allocation2 + $0x38] sm:$0xff] }
  0x24   :  { %223 = vmatpush.msra.mxu1 %v143_v15  ;;  %488 = vmatpush.msra.mxu2 %v143_v15  ;;  %v112_v47 = vld [vmem:[#allocation2 + $0xc8] sm:$0xff]  ;;  %v95_v48 = vld [vmem:[#allocation2 + $0x40] sm:$0xff]  ;;  %v113_v49 = vld [vmem:[#allocation2 + $0xd0] sm:$0xff] }
  0x25   :  { %159 = vmatpush.msra.mxu0 %v126_v16  ;;  %473 = vmatpush.msra.mxu3 %v126_v16  ;;  %v96_v50 = vld [vmem:[#allocation2 + $0x48] sm:$0xff]  ;;  %v114_v51 = vld [vmem:[#allocation2 + $0xd8] sm:$0xff]  ;;  %v97_v52 = vld [vmem:[#allocation2 + $0x50] sm:$0xff] }
  0x26   :  { %224 = vmatpush.msra.mxu1 %v142_v17  ;;  %489 = vmatpush.msra.mxu2 %v142_v17  ;;  %v115_v53 = vld [vmem:[#allocation2 + $0xe0] sm:$0xff]  ;;  %v98_v54 = vld [vmem:[#allocation2 + $0x58] sm:$0xff]  ;;  %v116_v55 = vld [vmem:[#allocation2 + $0xe8] sm:$0xff] }
  0x27   :  { %160 = vmatpush.msra.mxu0 %v125_v18  ;;  %474 = vmatpush.msra.mxu3 %v125_v18  ;;  %v99_v56 = vld [vmem:[#allocation2 + $0x60] sm:$0xff]  ;;  %v117_v57 = vld [vmem:[#allocation2 + $0xf0] sm:$0xff]  ;;  %v100_v58 = vld [vmem:[#allocation2 + $0x68] sm:$0xff] }
  0x28   :  { %225 = vmatpush.msra.mxu1 %v141_v19  ;;  %490 = vmatpush.msra.mxu2 %v141_v19  ;;  %v118_v59 = vld [vmem:[#allocation2 + $0xf8] sm:$0xff]  ;;  %v101_v60 = vld [vmem:[#allocation2 + $0x70] sm:$0xff]  ;;  %v103_v62 = vld [vmem:[#allocation2 + $0x80] sm:$0xff] }
  0x29   :  { %161 = vmatpush.msra.mxu0 %v124_v20  ;;  %475 = vmatpush.msra.mxu3 %v124_v20  ;;  %v102_v61 = vld [vmem:[#allocation2 + $0x78] sm:$0xff]  ;;  %v104_v63 = vld [vmem:[#allocation2 + $0x88] sm:$0xff]  ;;  %v389_v18 = vld [vmem:[#allocation8 + $0x70] sm:$0xff] }
  0x2a   :  { %226 = vmatpush.msra.mxu1 %v140_v21  ;;  %491 = vmatpush.msra.mxu2 %v140_v21  ;;  %v390_v9 = vld [vmem:[#allocation8 + $0x78] sm:$0xff]  ;;  %v388_v19 = vld [vmem:[#allocation8 + $0x68] sm:$0xff]  ;;  %v387_v21 = vld [vmem:[#allocation8 + $0x60] sm:$0xff] }
  0x2b   :  { %162 = vmatpush.msra.mxu0 %v123_v22  ;;  %476 = vmatpush.msra.mxu3 %v123_v22  ;;  %v386_v22 = vld [vmem:[#allocation8 + $0x58] sm:$0xff] }
  0x2c   :  { %227 = vmatpush.msra.mxu1 %v139_v23  ;;  %492 = vmatpush.msra.mxu2 %v139_v23 }
  0x2d   :  { %163 = vmatpush.msra.mxu0 %v122_v24  ;;  %477 = vmatpush.msra.mxu3 %v122_v24  ;;  %v385_v24 = vld [vmem:[#allocation8 + $0x50] sm:$0xff] }
  0x2e   :  { %228 = vmatpush.msra.mxu1 %v138_v25  ;;  %493 = vmatpush.msra.mxu2 %v138_v25 }
  0x2f   :  { %164 = vmatpush.msra.mxu0 %v121_v26  ;;  %478 = vmatpush.msra.mxu3 %v121_v26 }
  0x30   :  { %229 = vmatpush.msra.mxu1 %v137_v27  ;;  %494 = vmatpush.msra.mxu2 %v137_v27 }
  0x31   :  { %165 = vmatpush.msra.mxu0 %v120_v28  ;;  %479 = vmatpush.msra.mxu3 %v120_v28 }
  0x32   :  { %230 = vmatpush.msra.mxu1 %v136_v29  ;;  %495 = vmatpush.msra.mxu2 %v136_v29 }
  0x33   :  { %166 = vmatpush.msra.mxu0 %v119_v30  ;;  %480 = vmatpush.msra.mxu3 %v119_v30  ;;  %v696_v30 = vld [vmem:[#allocation7 + $0x8] sm:$0xff] }
  0x34   :  { %231 = vmatpush.msra.mxu1 %v135_v31  ;;  %496 = vmatpush.msra.mxu2 %v135_v31 }
  0x35   :  { %167 = vmatmul.f32.vlgmr.msra.gmra.mxu0 %v87_v32  ;;  %194 = vmatmul.f32.vlgmr.msra.gmra.mxu3 %v105_v33  ;;  %v384_v33 = vld [vmem:[#allocation8 + $0x48] sm:$0xff] }
  0x36   :  { %232 = vmatmul.f32.vlgmr.msra.gmra.mxu1 %v88_v34  ;;  %259 = vmatmul.f32.vlgmr.msra.gmra.mxu2 %v106_v35  ;;  %v699_v35 = vld [vmem:[#allocation7] sm:$0xff] }
  0x37   :  { %425 = vmatpush.msrb.mxu2 %v390_v9 }
  0x39   :  { %426 = vmatpush.msrb.mxu2 %v389_v18 }
  0x3b   :  { %427 = vmatpush.msrb.mxu2 %v388_v19 }
  0x3d   :  { %170 = vmatmul.f32.gmra.mxu0 %v89_v36  ;;  %197 = vmatmul.f32.gmra.mxu3 %v107_v37  ;;  %v383_v37 = vld [vmem:[#allocation8 + $0x40] sm:$0xff] }
  0x3e   :  { %235 = vmatmul.f32.gmra.mxu1 %v90_v38  ;;  %262 = vmatmul.f32.gmra.mxu2 %v108_v39 }
  0x3f   :  { %428 = vmatpush.msrb.mxu2 %v387_v21 }
  0x41   :  { %429 = vmatpush.msrb.mxu2 %v386_v22 }
  0x43   :  { %430 = vmatpush.msrb.mxu2 %v385_v24 }
  0x45   :  { %173 = vmatmul.f32.gmra.mxu0 %v91_v40  ;;  %200 = vmatmul.f32.gmra.mxu3 %v109_v41 }
  0x46   :  { %238 = vmatmul.f32.gmra.mxu1 %v92_v42  ;;  %265 = vmatmul.f32.gmra.mxu2 %v110_v43 }
  0x47   :  { %431 = vmatpush.msrb.mxu2 %v384_v33 }
  0x49   :  { %432 = vmatpush.msrb.mxu2 %v383_v37 }
  0x4d   :  { %176 = vmatmul.f32.gmra.mxu0 %v93_v44  ;;  %203 = vmatmul.f32.gmra.mxu3 %v111_v45 }
  0x4e   :  { %241 = vmatmul.f32.gmra.mxu1 %v94_v46  ;;  %268 = vmatmul.f32.gmra.mxu2 %v112_v47  ;;  %v382_v46 = vld [vmem:[#allocation8 + $0x38] sm:$0xff] }
  0x4f   :  { %433 = vmatpush.msrb.mxu2 %v382_v46 }
  0x55   :  { %179 = vmatmul.f32.gmra.mxu0 %v95_v48  ;;  %206 = vmatmul.f32.gmra.mxu3 %v113_v49 }
  0x56   :  { %244 = vmatmul.f32.gmra.mxu1 %v96_v50  ;;  %271 = vmatmul.f32.gmra.mxu2 %v114_v51 }
  0x5d   :  { %182 = vmatmul.f32.gmra.mxu0 %v97_v52  ;;  %209 = vmatmul.f32.gmra.mxu3 %v115_v53  ;;  %v381_v52 = vld [vmem:[#allocation8 + $0x30] sm:$0xff] }
  0x5e   :  { %247 = vmatmul.f32.gmra.mxu1 %v98_v54  ;;  %274 = vmatmul.f32.gmra.mxu2 %v116_v55 }
  0x5f   :  { %434 = vmatpush.msrb.mxu2 %v381_v52 }
  0x65   :  { %185 = vmatmul.f32.gmra.mxu0 %v99_v56  ;;  %212 = vmatmul.f32.gmra.mxu3 %v117_v57 }
  0x66   :  { %250 = vmatmul.f32.gmra.mxu1 %v100_v58  ;;  %277 = vmatmul.f32.gmra.mxu2 %v118_v59  ;;  %v380_v59 = vld [vmem:[#allocation8 + $0x28] sm:$0xff] }
  0x67   :  { %435 = vmatpush.msrb.mxu2 %v380_v59 }
  0x6d   :  { %188 = vmatmul.f32.gmra.mxu0 %v101_v60 }
  0x6e   :  { %253 = vmatmul.f32.gmra.mxu1 %v102_v61 }
  0x75   :  { %191 = vmatmul.f32.gmra.mxu0 %v103_v62 }
  0x76   :  { %256 = vmatmul.f32.gmra.mxu1 %v104_v63 }
  0xb2   :  { %v168_v0 = vpop.f32.mrf.mxu0 }
  0xb3   :  { %v233_v1 = vpop.f32.mrf.mxu1 }
  0xb4   :  { %v234_v47 = vadd.f32 %v233_v1, %v168_v0  ;;  %v379_v0 = vld [vmem:[#allocation8 + $0x20] sm:$0xff] }
  0xb5   :  { %436 = vmatpush.msrb.mxu2 %v379_v0 }
  0xb6   :  { %v283_v60 = vadd.f32 %v699_v35, %v234_v47 }
  0xb8   :  { %v692_v2 = vpop.f32.mrf.mxu3 }
  0xb9   :  { %v694_v3 = vpop.f32.mrf.mxu2 }
  0xba   :  { %v171_v4 = vpop.f32.mrf.mxu0  ;;  %v261_v37 = vadd.f32 %v694_v3, %v692_v2 }
  0xbb   :  { %v236_v5 = vpop.f32.mrf.mxu1 }
  0xbc   :  { %v237_v38 = vadd.f32 %v236_v5, %v171_v4 }
  0xbe   :  { %v284_v53 = vadd.f32 %v696_v30, %v237_v38 }
  0xc0   :  { %v198_v6 = vpop.f32.mrf.mxu3  ;;  %v299_v1 = vmax.f32 %v283_v60, %v284_v53 }
  0xc1   :  { %v263_v7 = vpop.f32.mrf.mxu2 }
  0xc2   :  { %v174_v8 = vpop.f32.mrf.mxu0  ;;  %v264_v39 = vadd.f32 %v263_v7, %v198_v6  ;;  %v378_v7 = vld [vmem:[#allocation8 + $0x18] sm:$0xff] }
  0xc3   :  { %v239_v10 = vpop.f32.mrf.mxu1  ;;  %437 = vmatpush.msrb.mxu2 %v378_v7 }
  0xc4   :  { %v240_v28 = vadd.f32 %v239_v10, %v174_v8  ;;  %v293_v54 = vadd.f32 %v699_v35, %v264_v39  ;;  %v377_v8 = vld [vmem:[#allocation8 + $0x10] sm:$0xff] }
  0xc5   :  { %438 = vmatpush.msrb.mxu2 %v377_v8 }
  0xc6   :  { %v285_v40 = vadd.f32 %v699_v35, %v240_v28 }
  0xc8   :  { %v201_v11 = vpop.f32.mrf.mxu3 }
  0xc9   :  { %v266_v12 = vpop.f32.mrf.mxu2 }
  0xca   :  { %v177_v13 = vpop.f32.mrf.mxu0  ;;  %v267_v41 = vadd.f32 %v266_v12, %v201_v11 }
  0xcb   :  { %v242_v14 = vpop.f32.mrf.mxu1 }
  0xcc   :  { %v243_v25 = vadd.f32 %v242_v14, %v177_v13  ;;  %v294_v55 = vadd.f32 %v696_v30, %v267_v41 }
  0xce   :  { %v286_v34 = vadd.f32 %v696_v30, %v243_v25  ;;  %v334_v4 = vmax.f32 %v293_v54, %v294_v55 }
  0xd0   :  { %v204_v15 = vpop.f32.mrf.mxu3  ;;  %v306_v48 = vmax.f32 %v285_v40, %v286_v34  ;;  %v335_v18 = vrot.slane %v334_v4, 4 }
  0xd1   :  { %v269_v16 = vpop.f32.mrf.mxu2 }
  0xd2   :  { %v180_v17 = vpop.f32.mrf.mxu0  ;;  %v270_v42 = vadd.f32 %v269_v16, %v204_v15  ;;  %v307_v61 = vrot.slane %v306_v48, 4  ;;  %v376_v16 = vld [vmem:[#allocation8 + $0x8] sm:$0xff] }
  0xd3   :  { %v245_v20 = vpop.f32.mrf.mxu1  ;;  %439 = vmatpush.msrb.mxu2 %v376_v16 }
  0xd4   :  { %v246_v31 = vadd.f32 %v245_v20, %v180_v17  ;;  %v295_v57 = vadd.f32 %v699_v35, %v270_v42  ;;  %v308_v9 = vmax.f32 %v306_v48, %v307_v61  ;;  %v300_v17 = vrot.slane %v299_v1, 4 }
  0xd6   :  { %v287_v43 = vadd.f32 %v699_v35, %v246_v31  ;;  %v309_v24 = vrot.slane %v308_v9, 2  ;;  %v336_v31 = vmax.f32 %v334_v4, %v335_v18 }
  0xd8   :  { %v207_v23 = vpop.f32.mrf.mxu3 }
  0xd9   :  { %v272_v26 = vpop.f32.mrf.mxu2 }
  0xda   :  { %v183_v27 = vpop.f32.mrf.mxu0  ;;  %v273_v44 = vadd.f32 %v272_v26, %v207_v23  ;;  %v375_v23 = vld [vmem:[#allocation8] sm:$0xff] }
  0xdb   :  { %v248_v29 = vpop.f32.mrf.mxu1  ;;  %440 = vmatpush.msrb.mxu2 %v375_v23 }
  0xdc   :  { %v249_v32 = vadd.f32 %v248_v29, %v183_v27  ;;  %v296_v58 = vadd.f32 %v696_v30, %v273_v44  ;;  %v301_v29 = vmax.f32 %v299_v1, %v300_v17 }
  0xde   :  { %v288_v36 = vadd.f32 %v696_v30, %v249_v32  ;;  %v341_v5 = vmax.f32 %v295_v57, %v296_v58  ;;  %v302_v42 = vrot.slane %v301_v29, 2 }
  0xe0   :  { %v210_v45 = vpop.f32.mrf.mxu3  ;;  %v313_v50 = vmax.f32 %v287_v43, %v288_v36  ;;  %v342_v20 = vrot.slane %v341_v5, 4  ;;  %v310_v36 = vmax.f32 %v308_v9, %v309_v24  ;;  %v337_v43 = vrot.slane %v336_v31, 2 }
  0xe1   :  { %v275_v49 = vpop.f32.mrf.mxu2  ;;  %v303_v54 = vmax.f32 %v301_v29, %v302_v42 }
  0xe2   :  { %v186_v51 = vpop.f32.mrf.mxu0  ;;  %v314_v62 = vrot.slane %v313_v50, 4  ;;  %v276_v63 = vadd.f32 %v275_v49, %v210_v45  ;;  %v343_v32 = vmax.f32 %v341_v5, %v342_v20  ;;  %v311_v48 = vrot.slane %v310_v36, 1 }
  0xe3   :  { %v251_v56 = vpop.f32.mrf.mxu1  ;;  %v338_v2 = vmax.f32 %v336_v31, %v337_v43 }
  0xe4   :  { %v315_v11 = vmax.f32 %v313_v50, %v314_v62  ;;  %v297_v12 = vadd.f32 %v699_v35, %v276_v63  ;;  %v252_v13 = vadd.f32 %v251_v56, %v186_v51  ;;  %v344_v45 = vrot.slane %v343_v32, 2  ;;  %v506_v63 = vld [vmem:[%s730_s3] ss:$0 sm:$0xff] }
  0xe5   :  { %v292_v50 = vadd.f32 %v696_v30, %v261_v37  ;;  %v312_v57 = vmax.f32 %v310_v36, %v311_v48  ;;  %v304_v62 = vrot.slane %v303_v54, 1 }
  0xe6   :  { %v316_v25 = vrot.slane %v315_v11, 2  ;;  %v289_v26 = vadd.f32 %v699_v35, %v252_v13  ;;  %v345_v3 = vmax.f32 %v343_v32, %v344_v45  ;;  %v507_v45 = vld [vmem:[%s732_s5] ss:$0 sm:$0xff] }
  0xe7   :  { %v305_v8 = vmax.f32 %v303_v54, %v304_v62 }
  0xe8   :  { %v213_v6 = vpop.f32.mrf.mxu3  ;;  %v317_v38 = vmax.f32 %v315_v11, %v316_v25  ;;  %v346_v0 = vrot.slane %v345_v3, 1 }
  0xe9   :  { %v278_v10 = vpop.f32.mrf.mxu2  ;;  %v359_v17 = vadd.f32 %v506_v63, %v305_v8 }
  0xea   :  { %v279_v14 = vadd.f32 %v278_v10, %v213_v6  ;;  %v189_v15 = vpop.f32.mrf.mxu0  ;;  %v318_v51 = vrot.slane %v317_v38, 1  ;;  %v347_v11 = vmax.f32 %v345_v3, %v346_v0 }
  0xeb   :  { %v254_v19 = vpop.f32.mrf.mxu1 }
  0xec   :  { %v298_v21 = vadd.f32 %v696_v30, %v279_v14  ;;  %v255_v22 = vadd.f32 %v254_v19, %v189_v15  ;;  %v319_v59 = vmax.f32 %v317_v38, %v318_v51 }
  0xee   :  { %v348_v27 = vmax.f32 %v297_v12, %v298_v21  ;;  %v290_v28 = vadd.f32 %v696_v30, %v255_v22  ;;  %v339_v30 = vrot.slane %v338_v2, 1  ;;  %v361_v6 = vadd.f32 %v506_v63, %v319_v59 }
  0xef   :  { %v365_v21 = vadd.f32 %v506_v63, %v347_v11 }
  0xf0   :  { %v349_v33 = vrot.slane %v348_v27, 4  ;;  %v320_v34 = vmax.f32 %v289_v26, %v290_v28  ;;  %v340_v9 = vmax.f32 %v338_v2, %v339_v30  ;;  %v369_v15 = vmax.f32 %v361_v6, 0.0 }
  0xf1   :  { %v367_v26 = vmax.f32 %v359_v17, 0.0  ;;  %v373_v31 = vmax.f32 %v365_v21, 0.0 }
  0xf2   :  { %v350_v39 = vmax.f32 %v348_v27, %v349_v33  ;;  %v321_v40 = vrot.slane %v320_v34, 4  ;;  %v192_v41 = vpop.f32.mrf.mxu0  ;;  %v364_v19 = vadd.f32 %v506_v63, %v340_v9  ;;  %v406_v24 = vrot.slane %v369_v15, 6 }
  0xf3   :  { %v257_v44 = vpop.f32.mrf.mxu1 }
  0xf4   :  { %v322_v46 = vmax.f32 %v320_v34, %v321_v40  ;;  %v258_v47 = vadd.f32 %v257_v44, %v192_v41  ;;  %v351_v49 = vrot.slane %v350_v39, 2  ;;  %v372_v28 = vmax.f32 %v364_v19, 0.0 }
  0xf5   :  { %v418_v40 = vrot.slane %v373_v31, 2 }
  0xf6   :  { %v323_v52 = vrot.slane %v322_v46, 2  ;;  %v291_v53 = vadd.f32 %v699_v35, %v258_v47  ;;  %v352_v58 = vmax.f32 %v350_v39, %v351_v49  ;;  %v360_v35 = vadd.f32 %v506_v63, %v312_v57 }
  0xf7   :  { %v415_v38 = vrot.slane %v372_v28, 3 }
  0xf8   :  { %v324_v55 = vmax.f32 %v322_v46, %v323_v52  ;;  %v327_v56 = vmax.f32 %v291_v53, %v292_v50  ;;  %v353_v5 = vrot.slane %v352_v58, 1  ;;  %v368_v13 = vmax.f32 %v360_v35, 0.0 }
  0xfa   :  { %v325_v60 = vrot.slane %v324_v55, 1  ;;  %v328_v61 = vrot.slane %v327_v56, 4  ;;  %v354_v14 = vmax.f32 %v352_v58, %v353_v5  ;;  %v403_v22 = vrot.slane %v368_v13, 7 }
  0xfc   :  { %v326_v1 = vmax.f32 %v324_v55, %v325_v60  ;;  %v329_v4 = vmax.f32 %v327_v56, %v328_v61  ;;  %v366_v23 = vadd.f32 %v506_v63, %v354_v14  ;;  %v405_v33 = vsel %vm404_vm0, %v403_v22, %v367_v26 }
  0xfd   :  { %v408_v34 = vsel %vm407_vm1, %v406_v24, %v405_v33 }
  0xfe   :  { %v330_v7 = vrot.slane %v329_v4, 2  ;;  %v362_v10 = vadd.f32 %v506_v63, %v326_v1  ;;  %v374_v32 = vmax.f32 %v366_v23, 0.0 }
 0x100   :  { %v331_v12 = vmax.f32 %v329_v4, %v330_v7  ;;  %v370_v18 = vmax.f32 %v362_v10, 0.0  ;;  %v421_v42 = vrot.slane %v374_v32, 1 }
 0x102   :  { %v332_v16 = vrot.slane %v331_v12, 1  ;;  %v409_v27 = vrot.slane %v370_v18, 5 }
 0x104   :  { %v333_v20 = vmax.f32 %v331_v12, %v332_v16  ;;  %v411_v37 = vsel %vm410_vm2, %v409_v27, %v408_v34 }
 0x106   :  { %v363_v25 = vadd.f32 %v506_v63, %v333_v20 }
 0x108   :  { %v371_v29 = vmax.f32 %v363_v25, 0.0 }
 0x10a   :  { %v412_v36 = vrot.slane %v371_v29, 4 }
 0x10c   :  { %v414_v39 = vsel %vm413_vm3, %v412_v36, %v411_v37 }
 0x10d   :  { %v417_v41 = vsel %vm416_vm4, %v415_v38, %v414_v39 }
 0x10e   :  { %v420_v43 = vsel %vm419_vm5, %v418_v40, %v417_v41 }
 0x10f   :  { %v423_v44 = vsel %vm422_vm6, %v421_v42, %v420_v43 }
 0x110   :  { %441 = vmatmul.f32.vlgmr.msrb.gmra.mxu2 %v423_v44 }
 0x193   :  { %v442_v46 = vpop.f32.mrf.mxu2 }
 0x194   :  { %v443_v47 = vadd.f32 %v507_v45, %v442_v46 }
 0x196   :  { %445 = vst [vmem:[#allocation10] sm:$0xff] %v443_v47 }
 0x197   :  { %456 = dma.vmem_to_hbm [thread:$0]  %s452_s21, 128, %s454_s24, [#allocation4]  }
 0x198   :  { %634 = dma.done.wait [#allocation4], 128  }
 0x199   :  { %635 = vsyncadd [#allocation4], 4294967168 }
 0x19a   :  { %461 = vsyncpa [#allocation3], 1 }
 0x19b   :  { %462 = vsyncpa [#allocation6], 1 }
 0x19c   :  { %463 = vsyncpa [#allocation9], 1 }
 0x19d   :  { %464 = vsyncpa [#allocation4], 1 }

</bundles_post_ra>
